<compile_context>
chip_gen: v6e
topology: v6e:2x2x1
jax: 0.10.0
libtpu: 0.0.40
codegen_flags: <defaults>
</compile_context>

<pallas_src>
import functools
import math

import jax
import jax.numpy as jnp
from jax.experimental import pallas as pl
from jax.experimental.pallas import tpu as pltpu


def _attn_pool_kernel(mask_ref, q_ref, kv_ref, o_ref, *, scale, num_queries):
    # Block shapes (per grid step, TB batch elements):
    #   mask_ref: (TB, 1, S) f32
    #   q_ref:    (TB*Q, H) or (TB, Q, H)   (native input dtype)
    #   kv_ref:   (TB, S, H)                (k == v == hidden_states)
    #   o_ref:    same layout family as q_ref
    tb, s, h = kv_ref.shape
    kv = kv_ref[...]                                    # native dtype -> MXU
    q = q_ref[...].reshape(tb, num_queries, h)          # no-op for 3-D layout

    # attention_scores = q @ k^T  (MXU, f32 accumulation)
    scores = jnp.einsum("bqd,bkd->bqk", q, kv,
                        preferred_element_type=jnp.float32)        # (TB, Q, S)

    # Scale on the f32 scores (not folded into a possibly-bf16 q) and mask bias
    # (1 - mask) * -10000 broadcast over the query axis.  Softmax math in f32.
    bias = (1.0 - mask_ref[...].astype(jnp.float32)) * -10000.0    # (TB, 1, S)
    scores = scores * jnp.float32(scale) + bias

    # Numerically-stable softmax; normalization deferred past the second matmul.
    m = jnp.max(scores, axis=-1, keepdims=True)
    p = jnp.exp(scores - m)                                        # (TB, Q, S)
    denom = jnp.sum(p, axis=-1, keepdims=True)                     # (TB, Q, 1)

    # TODO(synk): dropout is identity in eval mode; training-mode stochastic
    # dropout (pltpu.prng_seed + prng_random_bits, scale by 1/(1-p)) not applied.

    ctx = jnp.einsum("bqk,bkd->bqd", p.astype(kv.dtype), kv,
                     preferred_element_type=jnp.float32)           # (TB, Q, H)
    # Normalize AFTER the matmul: Q*H scaling work instead of Q*S divides; the
    # exact reciprocal runs on the otherwise idle EUP/VPU slack.
    ctx = ctx * pl.reciprocal(denom, approx=False)
    o_ref[...] = ctx.reshape(o_ref.shape).astype(o_ref.dtype)


def _hw_params():
    """(hidden-tile target bytes, usable VMEM budget bytes), generation aware."""
    try:
        kind = jax.devices()[0].device_kind.lower()
    except Exception:
        kind = ""
    # Bigger per-step DMAs amortize the ~0.35 us fixed grid-step cost: ~8 MiB
    # keeps it ~10% at v6e/v7x bandwidth, ~4 MiB is enough on v5e.
    target_bytes = (4 << 20) if "v5" in kind else (8 << 20)
    try:
        vmem_cap = int(pltpu.get_tpu_info().vmem_capacity_bytes)
    except Exception:
        vmem_cap = 64 << 20        # conservative fallback: v7x physical VMEM
    return target_bytes, int(0.6 * vmem_cap)


def _vmem_need(tb, S, Q, H, itemsize):
    """Per-step VMEM: double-buffered blocks + f32 in-kernel intermediates."""
    blocks = 2 * (tb * 1 * S * 4            # mask (f32)
                  + tb * Q * H * itemsize   # queries
                  + tb * S * H * itemsize   # hidden_states (k == v)
                  + tb * Q * H * itemsize)  # output
    # scores, probs, broadcast bias (~Q*S each) + f32 q/ctx copies (~Q*H each).
    interm = (3 * tb * Q * S + 3 * tb * Q * H) * 4
    return blocks + interm


def _select_batch_tile(B, S, Q, H, itemsize, target_bytes, vmem_budget):
    # Keep >= min(B, 4) grid steps (megacore occupancy + pipelining); within
    # that cap take the largest TB whose hidden_states tile fits target_bytes
    # and whose total VMEM need fits the budget.  TB need not divide B: the
    # grid uses cdiv and the final block may be partial (batch rows are
    # independent; out-of-bounds writes are dropped).
    tb_cap = max(1, B // min(B, 4))
    tb = 1
    for cand in range(1, tb_cap + 1):
        if (cand * S * H * itemsize <= target_bytes
                and _vmem_need(cand, S, Q, H, itemsize) <= vmem_budget):
            tb = cand
    return tb


def reduced_attention_pooling(hidden_states, queries, attention_mask=None, *,
                              hidden_size=None, dropout_prob=0.0,
                              compute_dtype=None):
    """Pallas implementation of ReducedAttentionPooling.forward (eval mode)."""
    B, S, H = hidden_states.shape
    _, Q, _ = queries.shape
    if hidden_size is None:
        hidden_size = H
    if attention_mask is None:
        attention_mask = jnp.ones((B, S), dtype=jnp.float32)
    # Mask kept as (B, 1, S): the size-1 middle dim keeps its BlockSpec
    # layout-legal for any TB; the sublane padding is negligible next to the
    # hidden_states DMA.
    attention_mask = attention_mask.astype(jnp.float32).reshape(B, 1, S)

    # Optional lower-precision compute (recommended on v5e): halves HBM bytes
    # and uses the bf16 MXU; f32 accumulation is still requested in-kernel.
    if compute_dtype is not None:
        hidden_states = hidden_states.astype(compute_dtype)
        queries = queries.astype(compute_dtype)
    out_dtype = hidden_states.dtype
    itemsize = jnp.dtype(hidden_states.dtype).itemsize

    target_bytes, vmem_budget = _hw_params()
    # TODO(synk): for very large S (single-batch K/V tile > target_bytes) the
    # sequence axis should additionally be tiled with an online softmax.
    TB = _select_batch_tile(B, S, Q, H, itemsize, target_bytes, vmem_budget)
    grid = (pl.cdiv(B, TB),)

    vmem_limit = int(min(max(_vmem_need(TB, S, Q, H, itemsize) + (4 << 20),
                             32 << 20),
                         vmem_budget))

    # Lane/sublane-dense layout for the Q-sized slabs when legal.
    flatten_qo = (TB * Q) % 8 == 0
    if flatten_qo:
        queries_in = queries.reshape(B * Q, H)
        q_spec = pl.BlockSpec((TB * Q, H), lambda b: (b, 0))
        o_spec = pl.BlockSpec((TB * Q, H), lambda b: (b, 0))
        out_shape = jax.ShapeDtypeStruct((B * Q, H), out_dtype)
    else:
        queries_in = queries
        q_spec = pl.BlockSpec((TB, Q, H), lambda b: (b, 0, 0))
        o_spec = pl.BlockSpec((TB, Q, H), lambda b: (b, 0, 0))
        out_shape = jax.ShapeDtypeStruct((B, Q, H), out_dtype)

    kernel = functools.partial(_attn_pool_kernel,
                               scale=1.0 / math.sqrt(hidden_size),
                               num_queries=Q)

    out = pl.pallas_call(
        kernel,
        out_shape=out_shape,
        grid_spec=pltpu.PrefetchScalarGridSpec(
            num_scalar_prefetch=0,
            grid=grid,
            in_specs=[
                pl.BlockSpec((TB, 1, S), lambda b: (b, 0, 0)),   # mask
                q_spec,                                          # queries
                pl.BlockSpec((TB, S, H), lambda b: (b, 0, 0)),   # hidden (k==v)
            ],
            out_specs=o_spec,
        ),
        compiler_params=pltpu.CompilerParams(
            dimension_semantics=("parallel",),
            vmem_limit_bytes=vmem_limit),
    )(attention_mask, queries_in, hidden_states)

    if flatten_qo:
        out = out.reshape(B, Q, H)
    return out


def _reference(hidden_states, queries, attention_mask, hidden_size):
    # Pure-JAX reference mirroring the PyTorch forward (eval mode).
    mask = (1.0 - attention_mask.astype(jnp.float32)[:, None, :]) * -10000.0
    scores = jnp.einsum("bqd,bkd->bqk", queries.astype(jnp.float32),
                        hidden_states.astype(jnp.float32)) / math.sqrt(hidden_size)
    scores = scores + mask
    probs = jax.nn.softmax(scores, axis=-1)
    return jnp.einsum("bqk,bkd->bqd", probs, hidden_states.astype(jnp.float32))


if __name__ == "__main__":
    key = jax.random.PRNGKey(0)

    # --- Primary small test (shapes consistent with the module) ---------------
    B, S, Q, H = 2, 16, 8, 32
    dropout_prob = 0.1  # inert in eval mode
    k1, k2, k3, k4, k5, k6, k7, k8 = jax.random.split(key, 8)
    hidden_states = jax.random.normal(k1, (B, S, H), dtype=jnp.float32)
    queries = jax.random.normal(k2, (B, Q, H), dtype=jnp.float32)
    attention_mask = jnp.ones((B, S), dtype=jnp.float32)
    attention_mask = attention_mask.at[1, -4:].set(0.0)  # non-trivial mask

    out = reduced_attention_pooling(hidden_states, queries, attention_mask,
                                    hidden_size=H, dropout_prob=dropout_prob)
    out = jax.block_until_ready(out)
    ref = _reference(hidden_states, queries, attention_mask, H)
    assert out.shape == (B, Q, H)
    assert jnp.allclose(out, ref, atol=2e-3, rtol=2e-3)

    # --- Secondary test: larger dims, grid of 4 steps --------------------------
    B2, S2, Q2, H2 = 4, 128, 8, 128
    hs2 = jax.random.normal(k3, (B2, S2, H2), dtype=jnp.float32)
    qr2 = jax.random.normal(k4, (B2, Q2, H2), dtype=jnp.float32)
    mk2 = (jax.random.uniform(k5, (B2, S2)) > 0.2).astype(jnp.float32)
    mk2 = mk2.at[:, 0].set(1.0)  # keep at least one valid key per row
    out2 = jax.block_until_ready(
        reduced_attention_pooling(hs2, qr2, mk2, hidden_size=H2))
    ref2 = _reference(hs2, qr2, mk2, H2)
    assert out2.shape == (B2, Q2, H2)
    assert jnp.allclose(out2, ref2, atol=2e-3, rtol=2e-3)

    # --- Third test: B not a multiple of TB (exercises cdiv partial block) -----
    B3, S3, Q3, H3 = 11, 64, 8, 64
    hs3 = jax.random.normal(k6, (B3, S3, H3), dtype=jnp.float32)
    qr3 = jax.random.normal(k7, (B3, Q3, H3), dtype=jnp.float32)
    mk3 = (jax.random.uniform(k8, (B3, S3)) > 0.3).astype(jnp.float32)
    mk3 = mk3.at[:, 0].set(1.0)
    out3 = jax.block_until_ready(
        reduced_attention_pooling(hs3, qr3, mk3, hidden_size=H3))
    ref3 = _reference(hs3, qr3, mk3, H3)
    assert out3.shape == (B3, Q3, H3)
    assert jnp.allclose(out3, ref3, atol=2e-3, rtol=2e-3)

    print("KERNEL_OK")
</pallas_src>

<mosaic_0001>
module attributes {stable_mosaic.version = 11 : i64} {
  func.func @_attn_pool_kernel(%arg0: i32, %arg1: memref<1x1x16xf32, #tpu.memory_space<vmem>>, %arg2: memref<8x32xf32, #tpu.memory_space<vmem>>, %arg3: memref<1x16x32xf32, #tpu.memory_space<vmem>>, %arg4: memref<8x32xf32, #tpu.memory_space<vmem>>) attributes {dimension_semantics = [#tpu.dimension_semantics<parallel>], iteration_bounds = array<i64: 2>, scalar_prefetch = 0 : i64, scratch_operands = 0 : i64, tpu.core_type = #tpu.core_type<tc>, window_params = [{transform_indices = @transform_0, window_bounds = array<i64: 1, 1, 16>}, {transform_indices = @transform_1, window_bounds = array<i64: 8, 32>}, {transform_indices = @transform_2, window_bounds = array<i64: 1, 16, 32>}, {transform_indices = @transform_3, window_bounds = array<i64: 8, 32>}]} {
    %c0 = arith.constant 0 : index
    %c0_0 = arith.constant 0 : index
    %c0_1 = arith.constant 0 : index
    %0 = vector.load %arg3[%c0, %c0_0, %c0_1] : memref<1x16x32xf32, #tpu.memory_space<vmem>>, vector<1x16x32xf32>
    %c0_2 = arith.constant 0 : index
    %c0_3 = arith.constant 0 : index
    %1 = vector.load %arg2[%c0_2, %c0_3] : memref<8x32xf32, #tpu.memory_space<vmem>>, vector<8x32xf32>
    %2 = vector.shape_cast %1 : vector<8x32xf32> to vector<1x8x32xf32>
    "tpu.trace_start"() <{level = 10 : i32, message = "bqd,bkd->bqk"}> : () -> ()
    %cst = arith.constant dense<0.000000e+00> : vector<1x8x16xf32>
    %3 = tpu.matmul %2, %0, %cst {dimension_numbers = #tpu.dot_dimension_numbers<[2], [2], [1], [1], [0, 0, 0, 1, 1, 1], [0], [0]>} : vector<1x8x32xf32>, vector<1x16x32xf32>, vector<1x8x16xf32> -> vector<1x8x16xf32>
    "tpu.trace_stop"() : () -> ()
    %c0_4 = arith.constant 0 : index
    %c0_5 = arith.constant 0 : index
    %c0_6 = arith.constant 0 : index
    %4 = vector.load %arg1[%c0_4, %c0_5, %c0_6] : memref<1x1x16xf32, #tpu.memory_space<vmem>>, vector<1x1x16xf32>
    %cst_7 = arith.constant 1.000000e+00 : f32
    %5 = vector.broadcast %cst_7 : f32 to vector<1x1x16xf32>
    %6 = arith.subf %5, %4 : vector<1x1x16xf32>
    %cst_8 = arith.constant -1.000000e+04 : f32
    %7 = vector.broadcast %cst_8 : f32 to vector<1x1x16xf32>
    %8 = arith.mulf %6, %7 : vector<1x1x16xf32>
    %cst_9 = arith.constant 0.176776692 : f32
    %9 = vector.broadcast %cst_9 : f32 to vector<1x8x16xf32>
    %10 = arith.mulf %3, %9 : vector<1x8x16xf32>
    %11 = vector.broadcast %8 : vector<1x1x16xf32> to vector<1x8x16xf32>
    %12 = arith.addf %10, %11 : vector<1x8x16xf32>
    %cst_10 = arith.constant dense<0xFF800000> : vector<1x8xf32>
    %13 = vector.multi_reduction <maximumf>, %12, %cst_10 [2] : vector<1x8x16xf32> to vector<1x8xf32>
    %14 = vector.shape_cast %13 : vector<1x8xf32> to vector<1x8x1xf32>
    %15 = vector.broadcast %14 : vector<1x8x1xf32> to vector<1x8x16xf32>
    %16 = arith.subf %12, %15 : vector<1x8x16xf32>
    %17 = math.exp %16 : vector<1x8x16xf32>
    %cst_11 = arith.constant dense<0.000000e+00> : vector<1x8xf32>
    %18 = vector.multi_reduction <add>, %17, %cst_11 [2] : vector<1x8x16xf32> to vector<1x8xf32>
    %19 = vector.shape_cast %18 : vector<1x8xf32> to vector<1x8x1xf32>
    "tpu.trace_start"() <{level = 10 : i32, message = "bqk,bkd->bqd"}> : () -> ()
    %cst_12 = arith.constant dense<0.000000e+00> : vector<1x8x32xf32>
    %20 = tpu.matmul %17, %0, %cst_12 {dimension_numbers = #tpu.dot_dimension_numbers<[2], [1], [1], [2], [0, 0, 0, 1, 1, 2], [0], [0]>} : vector<1x8x16xf32>, vector<1x16x32xf32>, vector<1x8x32xf32> -> vector<1x8x32xf32>
    "tpu.trace_stop"() : () -> ()
    %21 = tpu.reciprocal %19 : vector<1x8x1xf32> -> vector<1x8x1xf32>
    %22 = vector.broadcast %21 : vector<1x8x1xf32> to vector<1x8x32xf32>
    %23 = arith.mulf %20, %22 : vector<1x8x32xf32>
    %24 = vector.shape_cast %23 : vector<1x8x32xf32> to vector<8x32xf32>
    %c0_13 = arith.constant 0 : index
    %c0_14 = arith.constant 0 : index
    %25 = vector.load %arg4[%c0_13, %c0_14] : memref<8x32xf32, #tpu.memory_space<vmem>>, vector<8x32xf32>
    tpu.vector_store %arg4[%c0_13, %c0_14], %24 {strides = array<i32>} : memref<8x32xf32, #tpu.memory_space<vmem>>, vector<8x32xf32>,
    return
  }
  func.func @transform_0(%arg0: i32) -> (i32, i32, i32) {
    %c0_i32 = arith.constant 0 : i32
    %c0_i32_0 = arith.constant 0 : i32
    %c0_i32_1 = arith.constant 0 : i32
    return %arg0, %c0_i32, %c0_i32_0 : i32, i32, i32
  }
  func.func @transform_1(%arg0: i32) -> (i32, i32) {
    %c0_i32 = arith.constant 0 : i32
    %c0_i32_0 = arith.constant 0 : i32
    return %arg0, %c0_i32 : i32, i32
  }
  func.func @transform_2(%arg0: i32) -> (i32, i32, i32) {
    %c0_i32 = arith.constant 0 : i32
    %c0_i32_0 = arith.constant 0 : i32
    %c0_i32_1 = arith.constant 0 : i32
    return %arg0, %c0_i32, %c0_i32_0 : i32, i32, i32
  }
  func.func @transform_3(%arg0: i32) -> (i32, i32) {
    %c0_i32 = arith.constant 0 : i32
    %c0_i32_0 = arith.constant 0 : i32
    return %arg0, %c0_i32 : i32, i32
  }
}

</mosaic_0001>

<bundles_post_ra>
// kernel: tpu_custom_call.1
= control target key start
LH: loop header
LB: loop body
LE: loop exit
PB: predicated region body
PF: predicated region fallthrough
CT: control target
= control target key end

     0   :  { %s1072_s0 = inlined_call_operand.hbm [shape: f32[2,1,16], index: 0, kind: input, shape index: {}]   ;;  %s1073_s1 = inlined_call_operand.hbm [shape: f32[16,32], index: 1, kind: input, shape index: {}]   ;;  %s1074_s2 = inlined_call_operand.hbm [shape: f32[2,16,32], index: 2, kind: input, shape index: {}]   ;;  %s1075_s3 = inlined_call_operand.hbm [shape: f32[16,32], index: 3, kind: output, shape index: {}]  }
   0x1   :  { %1078 = sst [smem:[#allocation12_spill]] %s1073_s1 }
   0x2   :  { %8 = vsyncpa [#allocation3], 0 }
   0x3   :  { %10 = vsyncpa [#allocation3 + $0x1], 0 }
   0x4   :  { %11 = vsyncpa [#allocation6], 0 }
   0x5   :  { %13 = vsyncpa [#allocation6 + $0x1], 0 }
   0x6   :  { %14 = vsyncpa [#allocation4], 0 }
   0x7   :  { %16 = vsyncpa [#allocation4 + $0x1], 0  ;;  %s849_s12 = smov 0   ;;  %s851_s13 = smov 0  }
   0x8   :  { %s853_s14 = smov 0   ;;  %s855_s15 = smov 0  }
   0x9 LB: > { %s870_s16 = sadd.s32 4294967295, %s819_s15   ;;  %s561_s17 = sadd.s32 4294967294, %s819_s15   ;;  %s819_s15 = sphi %s855_s15, %s1095_s15   ;;  %s815_s14 = sphi %s853_s14, %s1094_s14   ;;  %s811_s13 = sphi %s851_s13, %s1093_s13   ;;  %s807_s12 = sphi %s849_s12, %s1092_s12  }
   0xa   : > { %s874_s18 = sadd.s32 1, %s819_s15   ;;  %s29_s19 = sadd.s32 1, %s815_s14 }
   0xb   : > { %s26_s20 = ssub.s32 %s819_s15, %s874_s18  ;;  %p36_p0 = scmp.ne.s32.totalorder %s815_s14, %s811_s13 }
   0xc   : > { %p27_p1 = scmp.eq.s32.totalorder %s26_s20, 0  ;;  %p37_p2 = scmp.eq.s32.totalorder %s819_s15, 0 }
   0xd   : > { %p42_p3 = scmp.ne.s32.totalorder %s811_s13, %s807_s12  ;;  %p43_p4 = scmp.eq.s32.totalorder %s870_s16, 0 }
   0xe   : > { %s886_s21 = scalar_select %p27_p1, %s815_s14, %s29_s19  }
   0xf   : > { %p38_p5 = por %p37_p2, %p36_p0  ;;  %p888_p6 = por %p43_p4, %p42_p3 }
  0x10   : > { %p118_p7 = scmp.eq.s32.totalorder %s870_s16, 1  ;;  %p124_p8 = scmp.eq.s32.totalorder %s561_s17, 1 }
  0x11   : > { %s1079_s22 = scalar_select %p888_p6, 1, 0 }
  0x12   : > { %p625_p10 = scmp.lt.s32.totalorder %s819_s15, 2  ;;  %p895_p11 = por %p118_p7, %p36_p0 }
  0x13   : > { %p899_p12 = por %p124_p8, %p42_p3  ;;  %s904_s25 = sand.u32 1, %s815_s14  }
  0x14   : > { %s1080_s23 = scalar_select %p895_p11, 1, 0 }
  0x15   : > { %s1081_s24 = scalar_select %p899_p12, 1, 0 }
  0x16   : > { %p906_p13 = pnand %p625_p10, %p38_p5  ;;  %s161_s27 = sand.u32 1, %s819_s15  }
  0x17   : > { %s565_s28 = sshll.u32 %s904_s25, 3  ;;  %s566_s29 = sshll.u32 %s819_s15, 7 }
  0x18   : > { %s1083_s1 = sld [smem:[#allocation12_spill]]  ;;  %s165_s6 = scalar_lea.vmem [#allocation5], %s565_s28 }
  0x19   : > { %s172_s7 = sshll.u32 %s165_s6, 4  ;;  %s919_s9 = scalar_lea.sflag [#allocation6], %s161_s27  ;;  %s173_s7 = int_to_ptr.vmem [resolvable:$true] %s172_s7 }
  0x1a   : > { %p925_p1 = pneg %p906_p13 }
  0x1e   : > { %s916_s5 = scalar_lea.hbm %s1083_s1, %s566_s29  ;;  %s672_s20 = scalar_lea.hbm %s1083_s1, 256 }
  0x1f   : > { %s667_s10 = scalar_lea.hbm %s916_s5, 128  ;;  %p673_p4 = scmp.lt.s32.totalorder %s916_s5, %s1083_s1 }
  0x20   : > { %p668_p0 = scmp.ne.s32.totalorder %s916_s5, %s667_s10  ;;  %p674_p5 = scmp.lt.s32.totalorder %s672_s20, %s667_s10 }
  0x22   : > { %p670_p2 = pnand %p925_p1, %p668_p0  ;;  %p675_p7 = por %p674_p5, %p673_p4 }
  0x24   : > { %p671_p3 = pneg %p670_p2 }
  0x26   : > { %p676_p8 = pnand %p675_p7, %p671_p3 }
  0x28   : > { %679 = shalt.err (!%p676_p8)
}
  0x29   : > { %s680_s27 = scalar_lea.vmem %s173_s7, 128  ;;  %s821_s30 = smov [#allocation5]  }
  0x2a   : > { %p681_p10 = scmp.ne.s32.totalorder %s173_s7, %s680_s27  ;;  %s685_s4 = sshll.u32 %s821_s30, 4  ;;  %s686_s4 = int_to_ptr.vmem [resolvable:$false] %s685_s4 }
  0x2b   : > { %s687_s6 = scalar_lea.vmem %s686_s4, 256  ;;  %p688_p0 = scmp.lt.s32.totalorder %s173_s7, %s686_s4 }
  0x2c   : > { %p683_p9 = pnand %p681_p10, %p925_p1  ;;  %p689_p2 = scmp.lt.s32.totalorder %s687_s6, %s680_s27 }
  0x2e   : > { %p684_p12 = pneg %p683_p9  ;;  %p690_p11 = por %p689_p2, %p688_p0 }
  0x30   : > { %p691_p6 = pnand %p690_p11, %p684_p12 }
  0x32   : > { %694 = shalt.err (!%p691_p6)
}
  0x33   : > { %617 = dma.hbm_to_vmem [thread:$0]  (!%p906_p13), %s916_s5, 128, %s173_s7, %s919_s9  }
  0x34   : > { %p570_p9 = scmp.ge.s32.totalorder %s819_s15, 1  ;;  %p198_p3 = scmp.lt.s32.totalorder %s819_s15, 3 }
  0x35   : > { %s564_s17 = sshll.u32 %s819_s15, 4  ;;  %s147_s29 = scalar_lea.vmem [#allocation2], %s904_s25 }
  0x36   : > { %p946_p4 = pnand %p570_p9, %p198_p3  ;;  %s954_s28 = scalar_lea.hbm %s1072_s0, %s564_s17 }
  0x37   : > { %s154_s27 = sshll.u32 %s147_s29, 4  ;;  %s145_s30 = scalar_lea.sflag [#allocation3], %s904_s25  ;;  %s155_s27 = int_to_ptr.vmem [resolvable:$true] %s154_s27 }
  0x38   : > { %s1085_s10 = scalar_select %p946_p4, 1, 0 }
  0x39   : > { %s695_s5 = scalar_lea.hbm %s954_s28, 16  ;;  %s700_s6 = scalar_lea.hbm %s1072_s0, 32 }
  0x3a   : > { %p696_p6 = scmp.ne.s32.totalorder %s954_s28, %s695_s5  ;;  %p701_p5 = scmp.lt.s32.totalorder %s954_s28, %s1072_s0 }
  0x3b   : > { %p702_p7 = scmp.lt.s32.totalorder %s700_s6, %s695_s5 }
  0x3c   : > { %p698_p11 = pnand %p696_p6, %p925_p1 }
  0x3d   : > { %p703_p8 = por %p702_p7, %p701_p5 }
  0x3e   : > { %p699_p12 = pneg %p698_p11 }
  0x40   : > { %p704_p10 = pnand %p703_p8, %p699_p12 }
  0x42   : > { %707 = shalt.err (!%p704_p10)
}
  0x43   : > { %s708_s17 = scalar_lea.vmem %s155_s27, 16  ;;  %s822_s20 = smov [#allocation2]  }
  0x44   : > { %p709_p0 = scmp.ne.s32.totalorder %s155_s27, %s708_s17  ;;  %s713_s29 = sshll.u32 %s822_s20, 4  ;;  %s714_s29 = int_to_ptr.vmem [resolvable:$false] %s713_s29 }
  0x45   : > { %s715_s1 = scalar_lea.vmem %s714_s29, 32  ;;  %p716_p3 = scmp.lt.s32.totalorder %s155_s27, %s714_s29 }
  0x46   : > { %p711_p2 = pnand %p709_p0, %p925_p1  ;;  %p717_p6 = scmp.lt.s32.totalorder %s715_s1, %s708_s17 }
  0x48   : > { %p712_p9 = pneg %p711_p2  ;;  %p718_p11 = por %p717_p6, %p716_p3 }
  0x4a   : > { %p719_p4 = pnand %p718_p11, %p712_p9 }
  0x4c   : > { %722 = shalt.err (!%p719_p4)
}
  0x4d   : > { %614 = dma.hbm_to_vmem [thread:$0]  (!%p906_p13), %s954_s28, 16, %s155_s27, %s145_s30  }
  0x4e   : > { %s582_s8 = sshll.u32 %s819_s15, 8  ;;  %s1086_s5 = sshll.u32 %s904_s25, 4 }
  0x4f   : > { %s183_s7 = scalar_lea.vmem [#allocation7], %s1086_s5  ;;  %s980_s20 = scalar_lea.hbm %s1074_s2, %s582_s8 }
  0x50   : > { %s190_s4 = sshll.u32 %s183_s7, 4  ;;  %s723_s1 = scalar_lea.hbm %s980_s20, 256  ;;  %s982_s4 = int_to_ptr.vmem [resolvable:$true] %s190_s4 }
  0x51   : > { %p724_p4 = scmp.ne.s32.totalorder %s980_s20, %s723_s1  ;;  %s728_s25 = scalar_lea.hbm %s1074_s2, 512 }
  0x52   : > { %p729_p7 = scmp.lt.s32.totalorder %s980_s20, %s1074_s2  ;;  %p730_p8 = scmp.lt.s32.totalorder %s728_s25, %s723_s1 }
  0x53   : > { %p726_p12 = pnand %p724_p4, %p925_p1 }
  0x54   : > { %p731_p10 = por %p730_p8, %p729_p7 }
  0x55   : > { %p727_p5 = pneg %p726_p12 }
  0x57   : > { %p732_p0 = pnand %p731_p10, %p727_p5 }
  0x59   : > { %735 = shalt.err (!%p732_p0)
}
  0x5a   : > { %s736_s29 = scalar_lea.vmem %s982_s4, 256  ;;  %s823_s8 = smov [#allocation7]  }
  0x5b   : > { %p737_p2 = scmp.ne.s32.totalorder %s982_s4, %s736_s29  ;;  %s741_s5 = sshll.u32 %s823_s8, 4  ;;  %s742_s5 = int_to_ptr.vmem [resolvable:$false] %s741_s5 }
  0x5c   : > { %s743_s7 = scalar_lea.vmem %s742_s5, 512  ;;  %p744_p6 = scmp.lt.s32.totalorder %s982_s4, %s742_s5 }
  0x5d   : > { %p739_p9 = pnand %p737_p2, %p925_p1  ;;  %p745_p11 = scmp.lt.s32.totalorder %s743_s7, %s736_s29 }
  0x5f   : > { %p740_p3 = pneg %p739_p9  ;;  %p746_p4 = por %p745_p11, %p744_p6 }
  0x61   : > { %p747_p12 = pnand %p746_p4, %p740_p3 }
  0x63   : > { %750 = shalt.err (!%p747_p12)
}
  0x64   : > { %s824_s6 = smov 128   ;;  %s825_s19 = smov 8  }
  0x65   : > { %620 = dma.hbm_to_vmem [thread:$0]  (!%p906_p13), %s980_s20, 256, %s982_s4, %s919_s9, %s824_s6, %s824_s6, %s825_s19  }
  0x66   : > { %p1087_p1 = scmp.ne.s32.totalorder %s1085_s10, 0 }
  0x67   : > { %s1008_s11 = sand.u32 (!%p1087_p1), 1, %s811_s13   ;;  %p1088_p5 = scmp.ne.s32.totalorder (!%p1087_p1), %s1079_s22, 0 }
  0x68   : > { %202 = sbr.rel (%p1087_p1) target bundleno = 685 (0x2ad), region = 32  ;;  %s205_s1 = scalar_lea.sflag (!%p1087_p1), [#allocation3], %s1008_s11 }
  0x69   : > { %s207_s28 = scalar_lea.vmem (!%p1087_p1), [#allocation2], %s1008_s11 }
  0x6d   : > { %794 = dma.done.wait (%p1088_p5), %s205_s1, 16  }
  0x6e   : > { %796 = vsyncadd (%p1088_p5), %s205_s1, 4294967280  ;;  %s212_s26 = sand.u32 1, %s870_s16   ;;  %s571_s9 = sshll.u32 %s1008_s11, 3 }
  0x6f   : > { %s213_s10 = scalar_lea.sflag [#allocation6], %s212_s26  ;;  %s216_s4 = scalar_lea.vmem [#allocation5], %s571_s9 }
  0x70   : > { %798 = dma.done.wait (%p1088_p5), %s213_s10, 384  }
  0x71   : > { %800 = vsyncadd (%p1088_p5), %s213_s10, 4294966912  ;;  %v826_v0 = vmov 0.0   ;;  %s572_s20 = sshll.u32 %s1008_s11, 4  ;;  %vm827_vm0 = vmmov 0   ;;  %vm260_vm1 = vcmask 261120   ;;  %v259_v3 = vld [vmem:[%s216_s4] sm:$0xff]  ;;  %v345_v4 = vlaneseq }
  0x72   : > { %589 = vmatprep.subr.mxu0 %v826_v0  ;;  %593 = vmatprep.mubr.msk.f32.mxu0 %vm827_vm0, %v826_v0  ;;  %s225_s27 = scalar_lea.vmem [#allocation7], %s572_s20  ;;  %v340_v5 = vld [vmem:[%s207_s28] sm:$0x1]  ;;  %vm351_vm2 = vcmask 130048   ;;  %s579_s22 = sshll.u32 %s870_s16, 7 }
  0x73   : > { %596 = vmatprep.subr.mxu1 %v826_v0  ;;  %600 = vmatprep.mubr.msk.f32.mxu1 %vm827_vm0, %v826_v0  ;;  %v258_v1 = vld [vmem:[%s225_s27 + $0x8] sm:$0xff]  ;;  %v257_v2 = vld [vmem:[%s225_s27] sm:$0xff]  ;;  %v341_v6 = vsub.f32 1.0, %v340_v5  ;;  %v346_v7 = vshrl.u32 %v345_v4, 7  ;;  %s256_s25 = scalar_lea.vmem [#allocation8], %s571_s9  ;;  %s1034_s8 = scalar_lea.hbm %s1075_s3, %s579_s22 }
  0x74   : > { %590 = vmatpush3.xpose.msk.msra.mxu0 %vm260_vm1, %v258_v1  ;;  %597 = vmatpush3.msra.mxu1 %v258_v1  ;;  %s451_s30 = sshll.u32 %s256_s25, 4  ;;  %s438_s5 = scalar_lea.sflag [#allocation4], %s1008_s11  ;;  %s452_s30 = int_to_ptr.vmem [resolvable:$true] %s451_s30 }
  0x75   : > { %591 = vmatprep.subr.mxu0 %v826_v0  ;;  %598 = vmatprep.subr.mxu1 %v826_v0  ;;  %v342_v8 = vmul.f32 -10000.0, %v341_v6  ;;  %v347_v9 = vsub.s32 0, %v346_v7  ;;  %s751_s7 = scalar_lea.vmem %s452_s30, 128  ;;  %p1089_p7 = scmp.ne.s32.totalorder %s1080_s23, 0 }
  0x76   : > { %599 = vmatpush3.msra.mxu1 %v257_v2  ;;  %p752_p13 = scmp.ne.s32.totalorder %s452_s30, %s751_s7  ;;  %s828_s16 = smov [#allocation8]  }
  0x77   : > { %v348_v10 = vrot.slane %v342_v8, %v347_v9  ;;  %s755_s6 = sshll.u32 %s828_s16, 4  ;;  %s756_s6 = int_to_ptr.vmem [resolvable:$false] %s755_s6 }
  0x78   : > { %592 = vmatpush3.xpose.msk.msra.mxu0 %vm260_vm1, %v257_v2  ;;  %p753_p8 = pnand %p752_p13, %p1089_p7  ;;  %s757_s19 = scalar_lea.vmem %s756_s6, 256 }
  0x79   : > { %p758_p0 = scmp.lt.s32.totalorder %s452_s30, %s756_s6  ;;  %p759_p2 = scmp.lt.s32.totalorder %s757_s19, %s751_s7 }
  0x7a   : > { %p754_p10 = pneg %p753_p8 }
  0x7b   : > { %594 = vmatmul.mubr.msk.f32.vlgmr.msra.gmra.mxu0 %vm260_vm1, %v259_v3  ;;  %p760_p9 = por %p759_p2, %p758_p0 }
  0x7d   : > { %p761_p3 = pnand %p760_p9, %p754_p10 }
 0x13b   : > { %v336_v11 = vpop.f32.mrf.mxu0 }
 0x13c   : > { %v343_v12 = vmul.f32 0.17677669, %v336_v11 }
 0x13d   : > { %v595_v13 = vpop.f32.mrf.mxu0 }
 0x13e   : > { %v350_v14 = vadd.f32 %v348_v10, %v343_v12 }
 0x140   : > { %v352_v15 = vsel %vm351_vm2, %v350_v14, -inf }
 0x141   : > { %353 = vmax.xlane.f32.xlu0 %v352_v15 }
 0x1ca   : > { %v354_v16 = vpop.xlane.xlu0 %353 }
 0x1cb   : > { %v355_v17 = vsub.f32 %v350_v14, %v354_v16 }
 0x1cd   : > { %v356_v18 = vmul.f32 1.442695, %v355_v17 }
 0x1cf   : > { %663 = vpow2.f32 %v356_v18 }
 0x1dc   : > { %v664_v19 = vpop.eup %663 }
 0x1dd   : > { %601 = vmatmul.mubr.msk.f32.vlgmr.msra.gmra.mxu1 %vm351_vm2, %v664_v19  ;;  %v358_v20 = vsel %vm351_vm2, %v664_v19, 0.0 }
 0x1de   : > { %359 = vadd.xlane.f32.xlu0 %v358_v20 }
 0x267   : > { %v360_v21 = vpop.xlane.xlu0 %359 }
 0x268   : > { %665 = vrcp.f32 %v360_v21 }
 0x275   : > { %v666_v22 = vpop.eup %665 }
 0x29d   : > { %v430_v23 = vpop.f32.mrf.mxu1 }
 0x29e   : > { %v435_v24 = vmul.f32 %v666_v22, %v430_v23 }
 0x29f   : > { %v602_v25 = vpop.f32.mrf.mxu1 }
 0x2a0   : > { %436 = vst.msk [vmem:[%s256_s25] sm:$0xff] %vm260_vm1, %v435_v24 }
 0x2a1   : > { %764 = shalt.err (!%p761_p3)
}
 0x2a2   : > { %s765_s1 = scalar_lea.hbm %s1034_s8, 128  ;;  %s769_s26 = scalar_lea.hbm %s1075_s3, 256 }
 0x2a3   : > { %p766_p6 = scmp.ne.s32.totalorder %s1034_s8, %s765_s1  ;;  %p770_p12 = scmp.lt.s32.totalorder %s1034_s8, %s1075_s3 }
 0x2a4   : > { %p771_p1 = scmp.lt.s32.totalorder %s769_s26, %s765_s1 }
 0x2a5   : > { %p767_p11 = pnand %p766_p6, %p1089_p7 }
 0x2a6   : > { %p772_p5 = por %p771_p1, %p770_p12 }
 0x2a7   : > { %p768_p4 = pneg %p767_p11 }
 0x2a9   : > { %p773_p13 = pnand %p772_p5, %p768_p4 }
 0x2ab   : > { %776 = shalt.err (!%p773_p13)
}
 0x2ac   : > { %609 = dma.vmem_to_hbm [thread:$0]  (%p1089_p7), %s452_s30, 128, %s1034_s8, %s438_s5  }
 0x2ad PF: > { %s463_s4 = sand.u32 1, %s807_s12   ;;  %p1090_p8 = scmp.ne.s32.totalorder %s1081_s24, 0 }
 0x2ae   : > { %p1091_p10 = scmp.ge.s32.totalorder %s819_s15, 2  ;;  %s464_s20 = scalar_lea.sflag [#allocation4], %s463_s4 }
 0x2b0   : > { %p622_p0 = pnand %p1091_p10, %p1090_p8 }
 0x2b2   : > { %p623_p2 = pneg %p622_p0 }
 0x2b4   : > { %802 = dma.done.wait (%p623_p2), %s464_s20, 128  }
 0x2b5   : > { %804 = vsyncadd (%p623_p2), %s464_s20, 4294967168  ;;  %p19_p9 = scmp.ge.s32.totalorder %s874_s18, 4   ;;  %s1092_s12 = smov %s811_s13 }
 0x2b6   : > { %s1093_s13 = smov %s815_s14  ;;  %s1094_s14 = smov %s886_s21 }
 0x2b7   : > { %s1095_s15 = smov %s874_s18  ;;  %21 = sbr.rel (!%p19_p9) target bundleno = 9 (0x9), region = 101 }
 0x2bc   :  { %469 = vsyncpa [#allocation3], 1 }
 0x2bd   :  { %471 = vsyncpa [#allocation3 + $0x1], 1 }
 0x2be   :  { %472 = vsyncpa [#allocation6], 1 }
 0x2bf   :  { %474 = vsyncpa [#allocation6 + $0x1], 1 }
 0x2c0   :  { %475 = vsyncpa [#allocation4], 1 }
 0x2c1   :  { %477 = vsyncpa [#allocation4 + $0x1], 1 }

</bundles_post_ra>
